<compile_context>
chip_gen: v6e
topology: v6e:2x2x1
jax: 0.10.0
libtpu: 0.0.40
codegen_flags: <defaults>
</compile_context>

<pallas_src>
import functools

import jax
import jax.numpy as jnp
from jax.experimental import pallas as pl
from jax.experimental.pallas import tpu as pltpu


# ------------------------------ Pallas kernel --------------------------------

def bcmdn_mlp_kernel(x_ref, w1_ref, b1_ref, w2_ref, b2_ref,
                     wh_ref, bh_ref, we2_ref, be2_ref,
                     wp2_ref, bp2_ref, wp3_ref, bp3_ref,
                     out_ref):
    # BatchNorm1d(28) (eval mode) is already folded into w1/b1; x arrives as bf16.
    # TODO(synk): training-mode BatchNorm (batch statistics over B*S) not implemented.
    x = x_ref[...]

    # Shared backbone: Linear(28,256) -> tanh -> Linear(256,256) -> tanh.
    # bf16 MXU operands, f32 accumulation; tanh on bf16 values (EUP, v6e/v7x).
    h = jnp.dot(x, w1_ref[...], preferred_element_type=jnp.float32) + b1_ref[...]
    h = jnp.tanh(h.astype(jnp.bfloat16))
    h = jnp.dot(h, w2_ref[...], preferred_element_type=jnp.float32) + b2_ref[...]
    h = jnp.tanh(h.astype(jnp.bfloat16))

    # Fused head entry: [encoder Linear(256,16) | prior Linear(256,16)] -> (tile, 32).
    fused = jnp.dot(h, wh_ref[...], preferred_element_type=jnp.float32) + bh_ref[...]
    fb = fused.astype(jnp.bfloat16)

    # Encoder tail: Linear(16, A*K), mu half only.  we2 is zero-padded over the
    # prior 16 fused rows, so no in-kernel lane slice of `fused` is needed.
    mu = jnp.dot(fb, we2_ref[...], preferred_element_type=jnp.float32) + be2_ref[...]

    # Prior tail: tanh -> Linear(16,16) (zero-padded over the encoder rows)
    # -> tanh -> Linear(16, K).
    pt = jnp.tanh(fb)
    p2 = jnp.dot(pt, wp2_ref[...], preferred_element_type=jnp.float32) + bp2_ref[...]
    p2 = jnp.tanh(p2.astype(jnp.bfloat16))
    logits = jnp.dot(p2, wp3_ref[...],
                     preferred_element_type=jnp.float32) + bp3_ref[...]

    # Categorical(logits).probs == softmax(logits, axis=-1).  Exact reciprocal so
    # probs sum to 1 to f32 accuracy (feeds transition_mat downstream).
    m = jnp.max(logits, axis=-1, keepdims=True)
    ex = jnp.exp(logits - m)
    probs = ex / jnp.sum(ex, axis=-1, keepdims=True)

    # Single lane-dense store: [mu | logits | probs | zero pad] -> (tile, out_cols),
    # out_cols a multiple of 128 lanes => one unmasked full-vreg store stream.
    ak = mu.shape[1]
    k = logits.shape[1]
    pad_cols = out_ref.shape[1] - (ak + 2 * k)
    pieces = [mu, logits, probs]
    if pad_cols > 0:
        pieces.append(jnp.zeros((mu.shape[0], pad_cols), jnp.float32))
    out_ref[...] = jnp.concatenate(pieces, axis=-1)


# -------------------------------- wrappers ------------------------------------

def _choose_tile_rows(n_rows, target_rows=1024):
    """Row tile: sublane-aligned (multiple of 8), capped at target_rows.
    Ragged tails are handled by zero-padding the rows, never by compiling the
    whole problem as a single block (VMEM cliff)."""
    if n_rows <= target_rows:
        return max(8, ((n_rows + 7) // 8) * 8)
    return target_rows  # multiple of 8


def prepare_params(params, act_dim, n_skill):
    """Fold BN, trim/fuse weights for the kernel, cast matmul operands to bf16."""
    ak = act_dim * n_skill
    bf, f32 = jnp.bfloat16, jnp.float32

    # Fold eval-mode BatchNorm affine into Linear(28,256), in f32 (single rounding).
    scale = params["scale"].astype(f32)          # (1, obs)
    shift = params["shift"].astype(f32)          # (1, obs)
    w1 = params["w1"].astype(f32)                # (obs, 256)
    b1 = params["b1"].astype(f32)                # (1, 256)
    w1_fold = w1 * scale.reshape(-1, 1)
    b1_fold = shift @ w1 + b1

    p = {
        "w1": w1_fold.astype(bf), "b1": b1_fold,
        "w2": params["w2"].astype(bf), "b2": params["b2"].astype(f32),
        # fused head entry: [we1 | wp1] -> (256, 32)
        "wh": jnp.concatenate([params["we1"], params["wp1"]], axis=1).astype(bf),
        "bh": jnp.concatenate([params["be1"], params["bp1"]], axis=1).astype(f32),
        "bp2": params["bp2"].astype(f32),
        "wp3": params["wp3"].astype(bf), "bp3": params["bp3"].astype(f32),
    }
    # encoder tail: keep only the mu columns, zero-pad over the prior 16 fused rows
    we2_mu = params["we2"][:, :ak]
    p["we2"] = jnp.concatenate([we2_mu, jnp.zeros_like(we2_mu)], axis=0).astype(bf)
    p["be2"] = params["be2"][:, :ak].astype(f32)
    # prior tail layer 2: zero-pad over the encoder 16 fused rows
    p["wp2"] = jnp.concatenate(
        [jnp.zeros_like(params["wp2"]), params["wp2"]], axis=0).astype(bf)
    return p


def run_fused(x_flat_bf16, prepped, *, act_dim, n_skill):
    n, obs_dim = x_flat_bf16.shape
    ak, k = act_dim * n_skill, n_skill
    out_cols = max(128, ((ak + 2 * k + 127) // 128) * 128)   # lane-dense output

    tile_rows = _choose_tile_rows(n)
    n_pad = int(pl.cdiv(n, tile_rows)) * tile_rows
    if n_pad != n:
        x_flat_bf16 = jnp.pad(x_flat_bf16, ((0, n_pad - n), (0, 0)))
    grid = (n_pad // tile_rows,)

    row = lambda d: pl.BlockSpec((tile_rows, d), lambda i: (i, 0))
    full = lambda a: pl.BlockSpec(a.shape, lambda i: (0,) * a.ndim)

    arg_order = ["w1", "b1", "w2", "b2", "wh", "bh",
                 "we2", "be2", "wp2", "bp2", "wp3", "bp3"]
    args = [prepped[name] for name in arg_order]

    slab = pl.pallas_call(
        bcmdn_mlp_kernel,
        grid=grid,
        in_specs=[row(obs_dim)] + [full(a) for a in args],
        out_specs=row(out_cols),
        out_shape=jax.ShapeDtypeStruct((n_pad, out_cols), jnp.float32),
        # No cross-iteration state: every row tile is independent -> megacore-able.
        compiler_params=pltpu.CompilerParams(
            dimension_semantics=("parallel",),
            vmem_limit_bytes=48 * 1024 * 1024),
    )(x_flat_bf16, *args)
    return slab[:n]


def bcmdn_forward(img, params, act_dim, n_skill):
    B, S, obs_dim = img.shape
    ak, k = act_dim * n_skill, n_skill

    x_flat = img.reshape(B * S, obs_dim).astype(jnp.bfloat16)
    prepped = prepare_params(params, act_dim, n_skill)
    slab = run_fused(x_flat, prepped, act_dim=act_dim, n_skill=n_skill)

    mu = slab[:, :ak].reshape(B, S, n_skill, act_dim)       # Normal mean
    logits = slab[:, ak:ak + k].reshape(B, S, k)
    probs = slab[:, ak + k:ak + 2 * k].reshape(B, S, k)      # Categorical.probs
    sigma = jnp.full_like(mu, 0.05)                          # Normal scale

    # cal_transition: sum_b (probs[:, :-1]^T @ probs[:, 1:]) + 1 per batch, then
    # row-normalize.  Tiny (K,K) XLA op in the wrapper (keeps the kernel parallel).
    counts = jnp.einsum("bti,btj->ij", probs[:, :-1], probs[:, 1:],
                        preferred_element_type=jnp.float32) + jnp.float32(B)
    transition_mat = counts / jnp.sum(counts, axis=1, keepdims=True)

    return {
        "latent_action_t": (mu, sigma),
        "next_pos_posterior": (mu, sigma),
        "goal_switching_posterior_probs": None,
        "goal_onehot_idx": probs,
        "goal_idx_seq": jnp.argmax(probs, axis=-1),
        "goal_seq": None,
        "states_prior": (mu, sigma),
        "image_dist": (mu, sigma),
        "goal_switching_prior": (logits, probs),
        "goal_posterior": None,
        "goal_prior": None,
        "transition_mat": transition_mat,
    }


# --------------------------- deterministic params -----------------------------

def _init_linear(key, fan_in, fan_out):
    # torch.nn.Linear default: U(-1/sqrt(fan_in), 1/sqrt(fan_in)) for W and b.
    kw, kb = jax.random.split(key)
    bound = 1.0 / jnp.sqrt(fan_in)
    w = jax.random.uniform(kw, (fan_in, fan_out), jnp.float32, -bound, bound)
    b = jax.random.uniform(kb, (1, fan_out), jnp.float32, -bound, bound)
    return w, b


def make_params(key, act_dim, n_skill, obs_dim=28):
    keys = jax.random.split(key, 8)
    p = {}
    # BatchNorm1d(28), eval mode: gamma=1, beta=0, running_mean=0, running_var=1
    eps = 1e-5
    gamma = jnp.ones((1, obs_dim), jnp.float32)
    beta = jnp.zeros((1, obs_dim), jnp.float32)
    rmean = jnp.zeros((1, obs_dim), jnp.float32)
    rvar = jnp.ones((1, obs_dim), jnp.float32)
    p["scale"] = gamma / jnp.sqrt(rvar + eps)
    p["shift"] = beta - rmean * p["scale"]
    # shared backbone
    p["w1"], p["b1"] = _init_linear(keys[0], obs_dim, 256)
    p["w2"], p["b2"] = _init_linear(keys[1], 256, 256)
    # encoder head
    p["we1"], p["be1"] = _init_linear(keys[2], 256, 16)
    p["we2"], p["be2"] = _init_linear(keys[3], 16, 2 * act_dim * n_skill)
    # prior / goal-switcher head
    p["wp1"], p["bp1"] = _init_linear(keys[4], 256, 16)
    p["wp2"], p["bp2"] = _init_linear(keys[5], 16, 16)
    p["wp3"], p["bp3"] = _init_linear(keys[6], 16, n_skill)
    return p


# ----------------------------------- main --------------------------------------

if __name__ == "__main__":
    B, S, OBS = 2, 8, 28       # obs_dim fixed at 28 by the module (Linear(28, 256))
    ACT_DIM, N_SKILL = 4, 5

    key = jax.random.PRNGKey(0)
    k_x, k_p = jax.random.split(key)
    img = jax.random.normal(k_x, (B, S, OBS), jnp.float32)
    params = make_params(k_p, ACT_DIM, N_SKILL, OBS)

    fwd = jax.jit(functools.partial(bcmdn_forward,
                                    act_dim=ACT_DIM, n_skill=N_SKILL))
    out = fwd(img, params)
    jax.block_until_ready(out)

    mu, sigma = out["latent_action_t"]
    assert mu.shape == (B, S, N_SKILL, ACT_DIM)
    assert sigma.shape == mu.shape
    assert out["goal_onehot_idx"].shape == (B, S, N_SKILL)
    assert out["goal_idx_seq"].shape == (B, S)
    assert out["transition_mat"].shape == (N_SKILL, N_SKILL)
    assert bool(jnp.all(jnp.isfinite(out["transition_mat"])))

    print("KERNEL_OK")
</pallas_src>

<mosaic_0001>
module attributes {stable_mosaic.version = 11 : i64} {
  func.func @bcmdn_mlp_kernel(%arg0: i32, %arg1: memref<16x28xbf16, #tpu.memory_space<vmem>>, %arg2: memref<28x256xbf16, #tpu.memory_space<vmem>>, %arg3: memref<1x256xf32, #tpu.memory_space<vmem>>, %arg4: memref<256x256xbf16, #tpu.memory_space<vmem>>, %arg5: memref<1x256xf32, #tpu.memory_space<vmem>>, %arg6: memref<256x32xbf16, #tpu.memory_space<vmem>>, %arg7: memref<1x32xf32, #tpu.memory_space<vmem>>, %arg8: memref<32x20xbf16, #tpu.memory_space<vmem>>, %arg9: memref<1x20xf32, #tpu.memory_space<vmem>>, %arg10: memref<32x16xbf16, #tpu.memory_space<vmem>>, %arg11: memref<1x16xf32, #tpu.memory_space<vmem>>, %arg12: memref<16x5xbf16, #tpu.memory_space<vmem>>, %arg13: memref<1x5xf32, #tpu.memory_space<vmem>>, %arg14: memref<16x128xf32, #tpu.memory_space<vmem>>) attributes {dimension_semantics = [#tpu.dimension_semantics<parallel>], iteration_bounds = array<i64: 1>, scalar_prefetch = 0 : i64, scratch_operands = 0 : i64, tpu.core_type = #tpu.core_type<tc>, window_params = [{transform_indices = @transform_0, window_bounds = array<i64: 16, 28>}, {pipeline_mode = #tpu.pipeline_mode<synchronous>, transform_indices = @transform_1, window_bounds = array<i64: 28, 256>}, {pipeline_mode = #tpu.pipeline_mode<synchronous>, transform_indices = @transform_2, window_bounds = array<i64: 1, 256>}, {pipeline_mode = #tpu.pipeline_mode<synchronous>, transform_indices = @transform_3, window_bounds = array<i64: 256, 256>}, {pipeline_mode = #tpu.pipeline_mode<synchronous>, transform_indices = @transform_4, window_bounds = array<i64: 1, 256>}, {pipeline_mode = #tpu.pipeline_mode<synchronous>, transform_indices = @transform_5, window_bounds = array<i64: 256, 32>}, {pipeline_mode = #tpu.pipeline_mode<synchronous>, transform_indices = @transform_6, window_bounds = array<i64: 1, 32>}, {pipeline_mode = #tpu.pipeline_mode<synchronous>, transform_indices = @transform_7, window_bounds = array<i64: 32, 20>}, {pipeline_mode = #tpu.pipeline_mode<synchronous>, transform_indices = @transform_8, window_bounds = array<i64: 1, 20>}, {pipeline_mode = #tpu.pipeline_mode<synchronous>, transform_indices = @transform_9, window_bounds = array<i64: 32, 16>}, {pipeline_mode = #tpu.pipeline_mode<synchronous>, transform_indices = @transform_10, window_bounds = array<i64: 1, 16>}, {pipeline_mode = #tpu.pipeline_mode<synchronous>, transform_indices = @transform_11, window_bounds = array<i64: 16, 5>}, {pipeline_mode = #tpu.pipeline_mode<synchronous>, transform_indices = @transform_12, window_bounds = array<i64: 1, 5>}, {transform_indices = @transform_13, window_bounds = array<i64: 16, 128>}]} {
    %c0 = arith.constant 0 : index
    %c0_0 = arith.constant 0 : index
    %0 = vector.load %arg1[%c0, %c0_0] : memref<16x28xbf16, #tpu.memory_space<vmem>>, vector<16x28xbf16>
    %c0_1 = arith.constant 0 : index
    %c0_2 = arith.constant 0 : index
    %1 = vector.load %arg2[%c0_1, %c0_2] : memref<28x256xbf16, #tpu.memory_space<vmem>>, vector<28x256xbf16>
    %cst = arith.constant dense<0.000000e+00> : vector<16x256xf32>
    %2 = tpu.matmul %0, %1, %cst {dimension_numbers = #tpu.dot_dimension_numbers<[1], [0], [0], [1], [0, 0, 1, 1], [], []>} : vector<16x28xbf16>, vector<28x256xbf16>, vector<16x256xf32> -> vector<16x256xf32>
    %c0_3 = arith.constant 0 : index
    %c0_4 = arith.constant 0 : index
    %3 = vector.load %arg3[%c0_3, %c0_4] : memref<1x256xf32, #tpu.memory_space<vmem>>, vector<1x256xf32>
    %4 = vector.broadcast %3 : vector<1x256xf32> to vector<16x256xf32>
    %5 = arith.addf %2, %4 : vector<16x256xf32>
    %6 = arith.truncf %5 : vector<16x256xf32> to vector<16x256xbf16>
    %7 = math.tanh %6 : vector<16x256xbf16>
    %c0_5 = arith.constant 0 : index
    %c0_6 = arith.constant 0 : index
    %8 = vector.load %arg4[%c0_5, %c0_6] : memref<256x256xbf16, #tpu.memory_space<vmem>>, vector<256x256xbf16>
    %cst_7 = arith.constant dense<0.000000e+00> : vector<16x256xf32>
    %9 = tpu.matmul %7, %8, %cst_7 {dimension_numbers = #tpu.dot_dimension_numbers<[1], [0], [0], [1], [0, 0, 1, 1], [], []>} : vector<16x256xbf16>, vector<256x256xbf16>, vector<16x256xf32> -> vector<16x256xf32>
    %c0_8 = arith.constant 0 : index
    %c0_9 = arith.constant 0 : index
    %10 = vector.load %arg5[%c0_8, %c0_9] : memref<1x256xf32, #tpu.memory_space<vmem>>, vector<1x256xf32>
    %11 = vector.broadcast %10 : vector<1x256xf32> to vector<16x256xf32>
    %12 = arith.addf %9, %11 : vector<16x256xf32>
    %13 = arith.truncf %12 : vector<16x256xf32> to vector<16x256xbf16>
    %14 = math.tanh %13 : vector<16x256xbf16>
    %c0_10 = arith.constant 0 : index
    %c0_11 = arith.constant 0 : index
    %15 = vector.load %arg6[%c0_10, %c0_11] : memref<256x32xbf16, #tpu.memory_space<vmem>>, vector<256x32xbf16>
    %cst_12 = arith.constant dense<0.000000e+00> : vector<16x32xf32>
    %16 = tpu.matmul %14, %15, %cst_12 {dimension_numbers = #tpu.dot_dimension_numbers<[1], [0], [0], [1], [0, 0, 1, 1], [], []>} : vector<16x256xbf16>, vector<256x32xbf16>, vector<16x32xf32> -> vector<16x32xf32>
    %c0_13 = arith.constant 0 : index
    %c0_14 = arith.constant 0 : index
    %17 = vector.load %arg7[%c0_13, %c0_14] : memref<1x32xf32, #tpu.memory_space<vmem>>, vector<1x32xf32>
    %18 = vector.broadcast %17 : vector<1x32xf32> to vector<16x32xf32>
    %19 = arith.addf %16, %18 : vector<16x32xf32>
    %20 = arith.truncf %19 : vector<16x32xf32> to vector<16x32xbf16>
    %c0_15 = arith.constant 0 : index
    %c0_16 = arith.constant 0 : index
    %21 = vector.load %arg8[%c0_15, %c0_16] : memref<32x20xbf16, #tpu.memory_space<vmem>>, vector<32x20xbf16>
    %cst_17 = arith.constant dense<0.000000e+00> : vector<16x20xf32>
    %22 = tpu.matmul %20, %21, %cst_17 {dimension_numbers = #tpu.dot_dimension_numbers<[1], [0], [0], [1], [0, 0, 1, 1], [], []>} : vector<16x32xbf16>, vector<32x20xbf16>, vector<16x20xf32> -> vector<16x20xf32>
    %c0_18 = arith.constant 0 : index
    %c0_19 = arith.constant 0 : index
    %23 = vector.load %arg9[%c0_18, %c0_19] : memref<1x20xf32, #tpu.memory_space<vmem>>, vector<1x20xf32>
    %24 = vector.broadcast %23 : vector<1x20xf32> to vector<16x20xf32>
    %25 = arith.addf %22, %24 : vector<16x20xf32>
    %26 = math.tanh %20 : vector<16x32xbf16>
    %c0_20 = arith.constant 0 : index
    %c0_21 = arith.constant 0 : index
    %27 = vector.load %arg10[%c0_20, %c0_21] : memref<32x16xbf16, #tpu.memory_space<vmem>>, vector<32x16xbf16>
    %cst_22 = arith.constant dense<0.000000e+00> : vector<16x16xf32>
    %28 = tpu.matmul %26, %27, %cst_22 {dimension_numbers = #tpu.dot_dimension_numbers<[1], [0], [0], [1], [0, 0, 1, 1], [], []>} : vector<16x32xbf16>, vector<32x16xbf16>, vector<16x16xf32> -> vector<16x16xf32>
    %c0_23 = arith.constant 0 : index
    %c0_24 = arith.constant 0 : index
    %29 = vector.load %arg11[%c0_23, %c0_24] : memref<1x16xf32, #tpu.memory_space<vmem>>, vector<1x16xf32>
    %30 = vector.broadcast %29 : vector<1x16xf32> to vector<16x16xf32>
    %31 = arith.addf %28, %30 : vector<16x16xf32>
    %32 = arith.truncf %31 : vector<16x16xf32> to vector<16x16xbf16>
    %33 = math.tanh %32 : vector<16x16xbf16>
    %c0_25 = arith.constant 0 : index
    %c0_26 = arith.constant 0 : index
    %34 = vector.load %arg12[%c0_25, %c0_26] : memref<16x5xbf16, #tpu.memory_space<vmem>>, vector<16x5xbf16>
    %cst_27 = arith.constant dense<0.000000e+00> : vector<16x5xf32>
    %35 = tpu.matmul %33, %34, %cst_27 {dimension_numbers = #tpu.dot_dimension_numbers<[1], [0], [0], [1], [0, 0, 1, 1], [], []>} : vector<16x16xbf16>, vector<16x5xbf16>, vector<16x5xf32> -> vector<16x5xf32>
    %c0_28 = arith.constant 0 : index
    %c0_29 = arith.constant 0 : index
    %36 = vector.load %arg13[%c0_28, %c0_29] : memref<1x5xf32, #tpu.memory_space<vmem>>, vector<1x5xf32>
    %37 = vector.broadcast %36 : vector<1x5xf32> to vector<16x5xf32>
    %38 = arith.addf %35, %37 : vector<16x5xf32>
    %cst_30 = arith.constant dense<0xFF800000> : vector<16xf32>
    %39 = vector.multi_reduction <maximumf>, %38, %cst_30 [1] : vector<16x5xf32> to vector<16xf32>
    %40 = vector.shape_cast %39 : vector<16xf32> to vector<16x1xf32>
    %41 = vector.broadcast %40 : vector<16x1xf32> to vector<16x5xf32>
    %42 = arith.subf %38, %41 : vector<16x5xf32>
    %43 = math.exp %42 : vector<16x5xf32>
    %cst_31 = arith.constant dense<0.000000e+00> : vector<16xf32>
    %44 = vector.multi_reduction <add>, %43, %cst_31 [1] : vector<16x5xf32> to vector<16xf32>
    %45 = vector.shape_cast %44 : vector<16xf32> to vector<16x1xf32>
    %46 = vector.broadcast %45 : vector<16x1xf32> to vector<16x5xf32>
    %47 = arith.divf %43, %46 : vector<16x5xf32>
    %cst_32 = arith.constant 0.000000e+00 : f32
    %48 = vector.broadcast %cst_32 : f32 to vector<16x98xf32>
    %49 = tpu.concatenate %25, %38, %47, %48 in 1 : vector<16x20xf32>, vector<16x5xf32>, vector<16x5xf32>, vector<16x98xf32> -> vector<16x128xf32>
    %c0_33 = arith.constant 0 : index
    %c0_34 = arith.constant 0 : index
    %50 = vector.load %arg14[%c0_33, %c0_34] : memref<16x128xf32, #tpu.memory_space<vmem>>, vector<16x128xf32>
    tpu.vector_store %arg14[%c0_33, %c0_34], %49 {strides = array<i32>} : memref<16x128xf32, #tpu.memory_space<vmem>>, vector<16x128xf32>,
    return
  }
  func.func @transform_0(%arg0: i32) -> (i32, i32) {
    %c0_i32 = arith.constant 0 : i32
    %c0_i32_0 = arith.constant 0 : i32
    return %arg0, %c0_i32 : i32, i32
  }
  func.func @transform_1(%arg0: i32) -> (i32, i32) {
    %c0_i32 = arith.constant 0 : i32
    %c0_i32_0 = arith.constant 0 : i32
    %c0_i32_1 = arith.constant 0 : i32
    return %c0_i32, %c0_i32_0 : i32, i32
  }
  func.func @transform_2(%arg0: i32) -> (i32, i32) {
    %c0_i32 = arith.constant 0 : i32
    %c0_i32_0 = arith.constant 0 : i32
    %c0_i32_1 = arith.constant 0 : i32
    return %c0_i32, %c0_i32_0 : i32, i32
  }
  func.func @transform_3(%arg0: i32) -> (i32, i32) {
    %c0_i32 = arith.constant 0 : i32
    %c0_i32_0 = arith.constant 0 : i32
    %c0_i32_1 = arith.constant 0 : i32
    return %c0_i32, %c0_i32_0 : i32, i32
  }
  func.func @transform_4(%arg0: i32) -> (i32, i32) {
    %c0_i32 = arith.constant 0 : i32
    %c0_i32_0 = arith.constant 0 : i32
    %c0_i32_1 = arith.constant 0 : i32
    return %c0_i32, %c0_i32_0 : i32, i32
  }
  func.func @transform_5(%arg0: i32) -> (i32, i32) {
    %c0_i32 = arith.constant 0 : i32
    %c0_i32_0 = arith.constant 0 : i32
    %c0_i32_1 = arith.constant 0 : i32
    return %c0_i32, %c0_i32_0 : i32, i32
  }
  func.func @transform_6(%arg0: i32) -> (i32, i32) {
    %c0_i32 = arith.constant 0 : i32
    %c0_i32_0 = arith.constant 0 : i32
    %c0_i32_1 = arith.constant 0 : i32
    return %c0_i32, %c0_i32_0 : i32, i32
  }
  func.func @transform_7(%arg0: i32) -> (i32, i32) {
    %c0_i32 = arith.constant 0 : i32
    %c0_i32_0 = arith.constant 0 : i32
    %c0_i32_1 = arith.constant 0 : i32
    return %c0_i32, %c0_i32_0 : i32, i32
  }
  func.func @transform_8(%arg0: i32) -> (i32, i32) {
    %c0_i32 = arith.constant 0 : i32
    %c0_i32_0 = arith.constant 0 : i32
    %c0_i32_1 = arith.constant 0 : i32
    return %c0_i32, %c0_i32_0 : i32, i32
  }
  func.func @transform_9(%arg0: i32) -> (i32, i32) {
    %c0_i32 = arith.constant 0 : i32
    %c0_i32_0 = arith.constant 0 : i32
    %c0_i32_1 = arith.constant 0 : i32
    return %c0_i32, %c0_i32_0 : i32, i32
  }
  func.func @transform_10(%arg0: i32) -> (i32, i32) {
    %c0_i32 = arith.constant 0 : i32
    %c0_i32_0 = arith.constant 0 : i32
    %c0_i32_1 = arith.constant 0 : i32
    return %c0_i32, %c0_i32_0 : i32, i32
  }
  func.func @transform_11(%arg0: i32) -> (i32, i32) {
    %c0_i32 = arith.constant 0 : i32
    %c0_i32_0 = arith.constant 0 : i32
    %c0_i32_1 = arith.constant 0 : i32
    return %c0_i32, %c0_i32_0 : i32, i32
  }
  func.func @transform_12(%arg0: i32) -> (i32, i32) {
    %c0_i32 = arith.constant 0 : i32
    %c0_i32_0 = arith.constant 0 : i32
    %c0_i32_1 = arith.constant 0 : i32
    return %c0_i32, %c0_i32_0 : i32, i32
  }
  func.func @transform_13(%arg0: i32) -> (i32, i32) {
    %c0_i32 = arith.constant 0 : i32
    %c0_i32_0 = arith.constant 0 : i32
    return %arg0, %c0_i32 : i32, i32
  }
}

</mosaic_0001>

<bundles_post_ra>
// kernel: bcmdn_forward.1
= control target key start
LH: loop header
LB: loop body
LE: loop exit
PB: predicated region body
PF: predicated region fallthrough
CT: control target
= control target key end

     0   :  { %vm90_vm0 = vcmask 1045504   ;;  %v1044_v1 = vmov 0   ;;  %vm86_vm1 = vcmask 228352   ;;  %v53_v42 = vlaneseq  ;;  %s1330_s1 = inlined_call_operand.vmem [shape: bf16[28,256], index: 1, kind: input, shape index: {}]   ;;  %s1331_s0 = inlined_call_operand.vmem [shape: bf16[16,28], index: 0, kind: input, shape index: {}]   ;;  %s1332_s3 = inlined_call_operand.vmem [shape: bf16[256,256], index: 3, kind: input, shape index: {}]   ;;  %s1333_s5 = inlined_call_operand.vmem [shape: bf16[256,32], index: 5, kind: input, shape index: {}]   ;;  %s1334_s2 = inlined_call_operand.vmem [shape: f32[1,256], index: 2, kind: input, shape index: {}]   ;;  %s1335_s4 = inlined_call_operand.vmem [shape: f32[1,256], index: 4, kind: input, shape index: {}]   ;;  %s1336_s7 = inlined_call_operand.vmem [shape: bf16[32,20], index: 7, kind: input, shape index: {}]   ;;  %s1337_s9 = inlined_call_operand.vmem [shape: bf16[32,16], index: 9, kind: input, shape index: {}]   ;;  %s1338_s6 = inlined_call_operand.vmem [shape: f32[1,32], index: 6, kind: input, shape index: {}]   ;;  %s1339_s11 = inlined_call_operand.vmem [shape: bf16[16,5], index: 11, kind: input, shape index: {}]   ;;  %s1340_s10 = inlined_call_operand.vmem [shape: f32[1,16], index: 10, kind: input, shape index: {}]   ;;  %s1341_s12 = inlined_call_operand.vmem [shape: f32[1,5], index: 12, kind: input, shape index: {}]   ;;  %s1342_s8 = inlined_call_operand.vmem [shape: f32[1,20], index: 8, kind: input, shape index: {}]   ;;  %s1343_s13 = inlined_call_operand.vmem [shape: f32[16,128], index: 13, kind: output, shape index: {}]  }
   0x1   :  { %v948_v0 = vld [vmem:[%s1330_s1 + $0x14] ss:$8 sps:$4 sm:$0x3f]   ;;  %129 = vmatprep.mubr.bf16.mxu0 %v1044_v1  ;;  %v950_v2 = vld [vmem:[%s1330_s1 + $0x10] ss:$8 sps:$4 sm:$0x3f]  }
   0x2   :  { %829 = vmatprep.subr.msk.bf16.mxu0 %vm90_vm0, %v948_v0  ;;  %v951_v3 = vld [vmem:[%s1330_s1 + $0x4] ss:$8 sps:$4 sm:$0xff]   ;;  %v92_v4 = vsel %vm90_vm0, %v950_v2, 0  ;;  %v953_v5 = vld [vmem:[%s1330_s1] ss:$8 sps:$4 sm:$0xff]   ;;  %v1003_v39 = vld [vmem:[%s1333_s5 + $0x78] sm:$0xff]  }
   0x3   :  { %110 = vmatpush1.bf16.msra.mxu0 %v92_v4  ;;  %v955_v6 = vld [vmem:[%s1332_s3 + $0x74] ss:$8 sps:$4 sm:$0xff]   ;;  %v957_v7 = vld [vmem:[%s1332_s3 + $0x70] ss:$8 sps:$4 sm:$0xff]   ;;  %v958_v8 = vld [vmem:[%s1332_s3 + $0x64] ss:$8 sps:$4 sm:$0xff]  }
   0x4   :  { %111 = vmatprep.subr.bf16.mxu0 %v951_v3  ;;  %348 = vmatprep.subr.bf16.mxu1 %v955_v6  ;;  %v954_v9 = vld [vmem:[%s1331_s0] sm:$0xff]   ;;  %v961_v11 = vld [vmem:[%s1332_s3 + $0x54] ss:$8 sps:$4 sm:$0xff]   ;;  %v963_v12 = vld [vmem:[%s1332_s3 + $0x50] ss:$8 sps:$4 sm:$0xff]   ;;  %v54_v43 = vshrl.u32 %v53_v42, 7 }
   0x5   :  { %349 = vmatpush1.bf16.msra.mxu1 %v957_v7  ;;  %v960_v10 = vld [vmem:[%s1332_s3 + $0x60] ss:$8 sps:$4 sm:$0xff]   ;;  %v964_v13 = vld [vmem:[%s1332_s3 + $0x44] ss:$8 sps:$4 sm:$0xff]   ;;  %v967_v15 = vld [vmem:[%s1332_s3 + $0x34] ss:$8 sps:$4 sm:$0xff]  }
   0x6   :  { %350 = vmatprep.subr.bf16.mxu1 %v958_v8  ;;  %v966_v14 = vld [vmem:[%s1332_s3 + $0x40] ss:$8 sps:$4 sm:$0xff]   ;;  %v969_v16 = vld [vmem:[%s1332_s3 + $0x30] ss:$8 sps:$4 sm:$0xff]   ;;  %v970_v17 = vld [vmem:[%s1332_s3 + $0x24] ss:$8 sps:$4 sm:$0xff]  }
   0x7   :  { %112 = vmatpush1.bf16.msra.mxu0 %v953_v5  ;;  %v972_v18 = vld [vmem:[%s1332_s3 + $0x20] ss:$8 sps:$4 sm:$0xff]   ;;  %v973_v19 = vld [vmem:[%s1332_s3 + $0x14] ss:$8 sps:$4 sm:$0xff]   ;;  %v975_v20 = vld [vmem:[%s1332_s3 + $0x10] ss:$8 sps:$4 sm:$0xff]  }
   0x8   :  { %v976_v21 = vld [vmem:[%s1332_s3 + $0x4] ss:$8 sps:$4 sm:$0xff]   ;;  %v978_v22 = vld [vmem:[%s1332_s3] ss:$8 sps:$4 sm:$0xff]   ;;  %v979_v23 = vld [vmem:[%s1332_s3 + $0xf4] ss:$8 sps:$4 sm:$0xff]   ;;  %891 = vmatprep.subr.bf16.mxu0 %v1003_v39 }
   0x9   :  { %351 = vmatpush1.bf16.msra.mxu1 %v960_v10  ;;  %v981_v24 = vld [vmem:[%s1332_s3 + $0xf0] ss:$8 sps:$4 sm:$0xff]   ;;  %v982_v25 = vld [vmem:[%s1332_s3 + $0xe4] ss:$8 sps:$4 sm:$0xff]   ;;  %v984_v26 = vld [vmem:[%s1332_s3 + $0xe0] ss:$8 sps:$4 sm:$0xff]  }
   0xa   :  { %830 = vmatmul.mubr.msk.bf16.vlgmr.msra.gmra.mxu0 %vm86_vm1, %v954_v9  ;;  %352 = vmatprep.subr.bf16.mxu1 %v961_v11  ;;  %v985_v27 = vld [vmem:[%s1332_s3 + $0xd4] ss:$8 sps:$4 sm:$0xff]   ;;  %v987_v28 = vld [vmem:[%s1332_s3 + $0xd0] ss:$8 sps:$4 sm:$0xff]   ;;  %v988_v29 = vld [vmem:[%s1332_s3 + $0xc4] ss:$8 sps:$4 sm:$0xff]  }
   0xb   :  { %v990_v30 = vld [vmem:[%s1332_s3 + $0xc0] ss:$8 sps:$4 sm:$0xff]   ;;  %v991_v31 = vld [vmem:[%s1332_s3 + $0xb4] ss:$8 sps:$4 sm:$0xff]   ;;  %v993_v32 = vld [vmem:[%s1332_s3 + $0xb0] ss:$8 sps:$4 sm:$0xff]  }
   0xc   :  { %v994_v33 = vld [vmem:[%s1332_s3 + $0xa4] ss:$8 sps:$4 sm:$0xff]   ;;  %v996_v34 = vld [vmem:[%s1332_s3 + $0xa0] ss:$8 sps:$4 sm:$0xff]   ;;  %v997_v35 = vld [vmem:[%s1332_s3 + $0x94] ss:$8 sps:$4 sm:$0xff]  }
   0xd   :  { %353 = vmatpush1.bf16.msra.mxu1 %v963_v12  ;;  %v999_v36 = vld [vmem:[%s1332_s3 + $0x90] ss:$8 sps:$4 sm:$0xff]   ;;  %v1000_v37 = vld [vmem:[%s1332_s3 + $0x84] ss:$8 sps:$4 sm:$0xff]   ;;  %v1002_v38 = vld [vmem:[%s1332_s3 + $0x80] ss:$8 sps:$4 sm:$0xff]  }
   0xe   :  { %354 = vmatprep.subr.bf16.mxu1 %v964_v13  ;;  %v1004_v40 = vld [vmem:[%s1333_s5 + $0x38] sm:$0xff]   ;;  %v1005_v41 = vld [vmem:[%s1333_s5 + $0x70] sm:$0xff]   ;;  %v55_v44 = vsub.s32 0, %v54_v43  ;;  %v51_v45 = vld [vmem:[%s1334_s2] sm:$0x3]  ;;  %v59_v46 = vsub.s32 1, %v54_v43 }
   0xf   :  { %892 = vmatpush3.bf16.msra.mxu0 %v1004_v40  ;;  %v1006_v61 = vld [vmem:[%s1333_s5 + $0x30] sm:$0xff]   ;;  %v1007_v62 = vld [vmem:[%s1333_s5 + $0x68] sm:$0xff]   ;;  %v1009_v0 = vld [vmem:[%s1333_s5 + $0x60] sm:$0xff]   ;;  %vm1046_vm2 = vmmov 0   ;;  %vm595_vm3 = vcmask 261120   ;;  %vm725_vm4 = vcmask 130048  }
  0x10   :  { %893 = vmatprep.subr.bf16.mxu0 %v1005_v41  ;;  %v56_v48 = vrot.slane %v51_v45, %v55_v44  ;;  %v60_v50 = vrot.slane %v51_v45, %v59_v46  ;;  %v1008_v63 = vld [vmem:[%s1333_s5 + $0x28] sm:$0xff]   ;;  %v1010_v1 = vld [vmem:[%s1333_s5 + $0x20] sm:$0xff]   ;;  %v1011_v2 = vld [vmem:[%s1333_s5 + $0x58] sm:$0xff]   ;;  %vm770_vm5 = vcmask 39936   ;;  %vm809_vm6 = vcmask 162816  }
  0x11   :  { %355 = vmatpush1.bf16.msra.mxu1 %v966_v14  ;;  %v1012_v3 = vld [vmem:[%s1333_s5 + $0x18] sm:$0xff]   ;;  %v1013_v4 = vld [vmem:[%s1333_s5 + $0x50] sm:$0xff]   ;;  %v1015_v6 = vld [vmem:[%s1333_s5 + $0x48] sm:$0xff]   ;;  %vm812_vm7 = vcmask 203776   ;;  %vm815_vm8 = vcmask 244736  }
  0x12   :  { %356 = vmatprep.subr.bf16.mxu1 %v967_v15  ;;  %v1014_v5 = vld [vmem:[%s1333_s5 + $0x10] sm:$0xff]   ;;  %v1016_v7 = vld [vmem:[%s1333_s5 + $0x8] sm:$0xff]   ;;  %v1017_v8 = vld [vmem:[%s1333_s5 + $0x40] sm:$0xff]  }
  0x13   :  { %894 = vmatpush3.bf16.msra.mxu0 %v1006_v61  ;;  %v1018_v9 = vld [vmem:[%s1333_s5] sm:$0xff]  }
  0x14   :  { %895 = vmatprep.subr.bf16.mxu0 %v1007_v62  ;;  %v176_v10 = vld [vmem:[%s1335_s4] sm:$0x3] }
  0x15   :  { %357 = vmatpush1.bf16.msra.mxu1 %v969_v16  ;;  %v181_v12 = vrot.slane %v176_v10, %v55_v44  ;;  %v185_v14 = vrot.slane %v176_v10, %v59_v46  ;;  %v1022_v39 = vld [vmem:[%s1337_s9] sm:$0xff]  }
  0x16   :  { %358 = vmatprep.subr.bf16.mxu1 %v970_v17  ;;  %v1023_v41 = vld [vmem:[%s1339_s11] sm:$0xff]  }
  0x17   :  { %896 = vmatpush3.bf16.msra.mxu0 %v1008_v63 }
  0x18   :  { %897 = vmatprep.subr.bf16.mxu0 %v1009_v0 }
  0x19   :  { %359 = vmatpush1.bf16.msra.mxu1 %v972_v18 }
  0x1a   :  { %360 = vmatprep.subr.bf16.mxu1 %v973_v19 }
  0x1b   :  { %898 = vmatpush3.bf16.msra.mxu0 %v1010_v1 }
  0x1c   :  { %899 = vmatprep.subr.bf16.mxu0 %v1011_v2 }
  0x1d   :  { %361 = vmatpush1.bf16.msra.mxu1 %v975_v20 }
  0x1e   :  { %362 = vmatprep.subr.bf16.mxu1 %v976_v21 }
  0x1f   :  { %900 = vmatpush3.bf16.msra.mxu0 %v1012_v3 }
  0x20   :  { %901 = vmatprep.subr.bf16.mxu0 %v1013_v4 }
  0x21   :  { %363 = vmatpush1.bf16.msra.mxu1 %v978_v22 }
  0x22   :  { %364 = vmatprep.subr.bf16.mxu1 %v979_v23 }
  0x23   :  { %902 = vmatpush3.bf16.msra.mxu0 %v1014_v5 }
  0x24   :  { %903 = vmatprep.subr.bf16.mxu0 %v1015_v6 }
  0x25   :  { %365 = vmatpush2.bf16.msra.mxu1 %v981_v24 }
  0x26   :  { %366 = vmatprep.subr.bf16.mxu1 %v982_v25  ;;  %v1019_v25 = vld [vmem:[%s1336_s7 + $0x8] sm:$0xff]  }
  0x27   :  { %904 = vmatpush3.bf16.msra.mxu0 %v1016_v7 }
  0x28   :  { %905 = vmatprep.subr.bf16.mxu0 %v1017_v8 }
  0x29   :  { %367 = vmatpush2.bf16.msra.mxu1 %v984_v26  ;;  %v1045_v26 = vmov 0.0  }
  0x2a   :  { %368 = vmatprep.subr.bf16.mxu1 %v985_v27  ;;  %v1020_v27 = vld [vmem:[%s1336_s7] sm:$0xff]  }
  0x2b   :  { %906 = vmatpush3.bf16.msra.mxu0 %v1018_v9 }
  0x2c   :  { %921 = vmatprep.subr.bf16.mxu0 %v1045_v26 }
  0x2d   :  { %369 = vmatpush2.bf16.msra.mxu1 %v987_v28 }
  0x2e   :  { %370 = vmatprep.subr.bf16.mxu1 %v988_v29 }
  0x31   :  { %371 = vmatpush2.bf16.msra.mxu1 %v990_v30 }
  0x32   :  { %372 = vmatprep.subr.bf16.mxu1 %v991_v31 }
  0x35   :  { %373 = vmatpush2.bf16.msra.mxu1 %v993_v32  ;;  %v863_v32 = vld [vmem:[%s1338_s6] ss:$0 sm:$0xff] }
  0x36   :  { %374 = vmatprep.subr.bf16.mxu1 %v994_v33 }
  0x39   :  { %375 = vmatpush2.bf16.msra.mxu1 %v996_v34 }
  0x3a   :  { %376 = vmatprep.subr.bf16.mxu1 %v997_v35 }
  0x3d   :  { %377 = vmatpush2.bf16.msra.mxu1 %v999_v36 }
  0x3e   :  { %378 = vmatprep.subr.bf16.mxu1 %v1000_v37  ;;  %v1021_v37 = vld [vmem:[%s1337_s9 + $0x8] sm:$0xff]  }
  0x41   :  { %379 = vmatpush2.bf16.msra.mxu1 %v1002_v38 }
  0xca   :  { %v131_v47 = vpop.f32.mrf.mxu0 }
  0xcb   :  { %v132_v53 = vadd.f32 %v131_v47, %v56_v48  ;;  %v884_v47 = vld [vmem:[%s1340_s10] ss:$0 sm:$0xff]  ;;  %s1047_s10 = smov 20  }
  0xcc   :  { %v133_v49 = vpop.f32.mrf.mxu0 }
  0xcd   :  { %v134_v55 = vadd.f32 %v133_v49, %v60_v50 }
  0xce   :  { %v135_v51 = vpop.f32.mrf.mxu0 }
  0xcf   :  { %v136_v52 = vadd.f32 %v135_v51, %v56_v48 }
  0xd0   :  { %v137_v54 = vpop.f32.mrf.mxu0 }
  0xd1   :  { %v138_v56 = vadd.f32 %v137_v54, %v60_v50  ;;  %v140_v57 = vpack.c.bf16 %v136_v52, %v132_v53 }
  0xd3   :  { %v141_v58 = vpack.c.bf16 %v138_v56, %v134_v55  ;;  %v888_v55 = vld [vmem:[%s1341_s12] ss:$0 sm:$0xff]  ;;  %s1048_s12 = smov 25  }
  0xd5   :  { %1024 = vtanh.bf16 %v141_v58 }
  0xd6   :  { %1026 = vtanh.bf16 %v140_v57 }
  0xe3   :  { %v1025_v59 = vpop.eup %1024 }
  0xe4   :  { %v1027_v60 = vpop.eup %1026  ;;  %380 = vmatprep.mubr.bf16.mxu1 %v1025_v59 }
  0xe5   :  { %381 = vmatmul.mubr.bf16.vlgmr.msra.gmra.mxu1 %v1027_v60 }
 0x1a5   :  { %v382_v11 = vpop.f32.mrf.mxu1 }
 0x1a6   :  { %v383_v17 = vadd.f32 %v382_v11, %v181_v12 }
 0x1a7   :  { %v384_v13 = vpop.f32.mrf.mxu1 }
 0x1a8   :  { %v385_v19 = vadd.f32 %v384_v13, %v185_v14 }
 0x1a9   :  { %v386_v15 = vpop.f32.mrf.mxu1 }
 0x1aa   :  { %v387_v16 = vadd.f32 %v386_v15, %v181_v12 }
 0x1ab   :  { %v388_v18 = vpop.f32.mrf.mxu1 }
 0x1ac   :  { %v389_v20 = vadd.f32 %v388_v18, %v185_v14  ;;  %v391_v21 = vpack.c.bf16 %v387_v16, %v383_v17  ;;  %v880_v16 = vld [vmem:[%s1342_s8] ss:$0 sm:$0xff] }
 0x1ae   :  { %v392_v22 = vpack.c.bf16 %v389_v20, %v385_v19 }
 0x1b0   :  { %1028 = vtanh.bf16 %v392_v22 }
 0x1b1   :  { %1030 = vtanh.bf16 %v391_v21 }
 0x1be   :  { %v1029_v23 = vpop.eup %1028 }
 0x1bf   :  { %v1031_v24 = vpop.eup %1030  ;;  %562 = vmatprep.mubr.bf16.mxu0 %v1029_v23 }
 0x1c0   :  { %563 = vmatmul.mubr.bf16.vlgmr.msra.gmra.mxu0 %v1031_v24 }
 0x1c1   :  { %922 = vmatpush3.bf16.msra.mxu0 %v1019_v25  ;;  %925 = vmatprep.mubr.msk.bf16.mxu0 %vm1046_vm2, %v1045_v26 }
 0x1c2   :  { %923 = vmatprep.subr.bf16.mxu0 %v1045_v26 }
 0x1c5   :  { %924 = vmatpush3.bf16.msra.mxu0 %v1020_v27 }
 0x1c6   :  { %929 = vmatprep.subr.bf16.mxu0 %v1045_v26 }
 0x280   :  { %v907_v28 = vpop.f32.mrf.mxu0 }
 0x282   :  { %v908_v29 = vpop.f32.mrf.mxu0 }
 0x283   :  { %v909_v31 = vadd.f32 %v908_v29, %v907_v28 }
 0x284   :  { %v910_v30 = vpop.f32.mrf.mxu0 }
 0x285   :  { %v565_v35 = vadd.f32 %v909_v31, %v863_v32 }
 0x286   :  { %v911_v33 = vpop.f32.mrf.mxu0 }
 0x287   :  { %v912_v34 = vadd.f32 %v911_v33, %v910_v30 }
 0x289   :  { %v568_v36 = vadd.f32 %v912_v34, %v863_v32 }
 0x28b   :  { %v571_v38 = vpack.c.bf16 %v568_v36, %v565_v35 }
 0x28d   :  { %1032 = vtanh.bf16 %v571_v38  ;;  %926 = vmatmul.mubr.msk.bf16.vlgmr.msra.gmra.mxu0 %vm595_vm3, %v571_v38 }
 0x28e   :  { %930 = vmatpush3.bf16.msra.mxu0 %v1021_v37  ;;  %933 = vmatprep.mubr.msk.bf16.mxu0 %vm1046_vm2, %v1045_v26 }
 0x28f   :  { %931 = vmatprep.subr.bf16.mxu0 %v1045_v26 }
 0x292   :  { %932 = vmatpush3.bf16.msra.mxu0 %v1022_v39 }
 0x293   :  { %937 = vmatprep.subr.bf16.mxu0 %v1045_v26 }
 0x29b   :  { %v1033_v40 = vpop.eup %1032 }
 0x29c   :  { %934 = vmatmul.mubr.msk.bf16.vlgmr.msra.gmra.mxu0 %vm595_vm3, %v1033_v40 }
 0x29d   :  { %939 = vmatprep.mubr.msk.bf16.mxu0 %vm1046_vm2, %v1045_v26  ;;  %938 = vmatpush3.bf16.msra.mxu0 %v1023_v41 }
 0x34d   :  { %v1305_v42 = vpop.f32.mrf.mxu0 }
 0x34e   :  { %v634_v19 = vadd.f32 %v880_v16, %v1305_v42 }
 0x34f   :  { %v927_v43 = vpop.f32.mrf.mxu0 }
 0x351   :  { %v1307_v44 = vpop.f32.mrf.mxu0 }
 0x352   :  { %v637_v23 = vadd.f32 %v880_v16, %v1307_v44 }
 0x353   :  { %v928_v45 = vpop.f32.mrf.mxu0 }
 0x35c   :  { %v701_v46 = vpop.f32.mrf.mxu0 }
 0x35d   :  { %v702_v50 = vadd.f32 %v884_v47, %v701_v46 }
 0x35e   :  { %v935_v48 = vpop.f32.mrf.mxu0 }
 0x360   :  { %v704_v49 = vpop.f32.mrf.mxu0 }
 0x361   :  { %v705_v51 = vadd.f32 %v884_v47, %v704_v49 }
 0x362   :  { %v936_v52 = vpop.f32.mrf.mxu0 }
 0x363   :  { %v708_v53 = vpack.c.bf16 %v705_v51, %v702_v50 }
 0x365   :  { %1034 = vtanh.bf16 %v708_v53 }
 0x373   :  { %v1035_v54 = vpop.eup %1034 }
 0x374   :  { %940 = vmatmul.mubr.msk.bf16.vlgmr.msra.gmra.mxu0 %vm725_vm4, %v1035_v54 }
 0x434   :  { %v763_v56 = vpop.f32.mrf.mxu0 }
 0x435   :  { %v764_v57 = vadd.f32 %v888_v55, %v763_v56 }
 0x436   :  { %v941_v58 = vpop.f32.mrf.mxu0 }
 0x437   :  { %v771_v59 = vsel %vm770_vm5, %v764_v57, -inf }
 0x438   :  { %772 = vmax.xlane.f32.xlu0 %v771_v59  ;;  %v766_v60 = vpop.f32.mrf.mxu0 }
 0x439   :  { %v767_v61 = vadd.f32 %v888_v55, %v766_v60 }
 0x43a   :  { %v942_v62 = vpop.f32.mrf.mxu0 }
 0x43b   :  { %v774_v63 = vsel %vm770_vm5, %v767_v61, -inf }
 0x43c   :  { %775 = vmax.xlane.f32.xlu0 %v774_v63 }
 0x452   :  { %795 = vrot.lane.b32.xlu0 %v764_v57, %s1047_s10 }
 0x4c1   :  { %v773_v0 = vpop.xlane.xlu0 %772 }
 0x4c2   :  { %v777_v1 = vsub.f32 %v764_v57, %v773_v0 }
 0x4c4   :  { %v779_v2 = vmul.f32 1.442695, %v777_v1 }
 0x4c5   :  { %v776_v3 = vpop.xlane.xlu0 %775 }
 0x4c6   :  { %1036 = vpow2.f32 %v779_v2  ;;  %v778_v4 = vsub.f32 %v767_v61, %v776_v3 }
 0x4c8   :  { %v781_v5 = vmul.f32 1.442695, %v778_v4 }
 0x4c9   :  { %v796_v18 = vpop.permute.xlu0 %795 }
 0x4ca   :  { %1038 = vpow2.f32 %v781_v5  ;;  %v810_v20 = vsel %vm809_vm6, %v634_v19, %v796_v18 }
 0x4d3   :  { %v1037_v6 = vpop.eup %1036 }
 0x4d4   :  { %v783_v7 = vsel %vm770_vm5, %v1037_v6, 0.0 }
 0x4d5   :  { %784 = vadd.xlane.f32.xlu1 %v783_v7 }
 0x4d7   :  { %v1039_v8 = vpop.eup %1038 }
 0x4d8   :  { %v786_v9 = vsel %vm770_vm5, %v1039_v8, 0.0 }
 0x4d9   :  { %787 = vadd.xlane.f32.xlu1 %v786_v9 }
 0x4ea   :  { %797 = vrot.lane.b32.xlu1 %v767_v61, %s1047_s10 }
 0x55e   :  { %v785_v10 = vpop.xlane.xlu1 %784 }
 0x55f   :  { %1040 = vrcp.f32 %v785_v10 }
 0x562   :  { %v788_v11 = vpop.xlane.xlu1 %787 }
 0x563   :  { %1042 = vrcp.f32 %v788_v11 }
 0x566   :  { %v798_v17 = vpop.permute.xlu1 %797 }
 0x567   :  { %v811_v25 = vsel %vm809_vm6, %v637_v23, %v798_v17 }
 0x56c   :  { %v1041_v12 = vpop.eup %1040 }
 0x56d   :  { %v790_v13 = vmul.f32 %v1041_v12, %v1037_v6 }
 0x56f   :  { %803 = vrot.lane.b32.xlu1 %v790_v13, %s1048_s12 }
 0x570   :  { %v1043_v14 = vpop.eup %1042 }
 0x571   :  { %v792_v15 = vmul.f32 %v1043_v14, %v1039_v8 }
 0x573   :  { %805 = vrot.lane.b32.xlu1 %v792_v15, %s1048_s12 }
 0x5e1   :  { %v804_v21 = vpop.permute.xlu1 %803 }
 0x5e2   :  { %v813_v22 = vsel %vm812_vm7, %v810_v20, %v804_v21 }
 0x5e3   :  { %v816_v24 = vsel %vm815_vm8, %v813_v22, 0.0 }
 0x5e4   :  { %818 = vst [vmem:[%s1343_s13] sm:$0xff] %v816_v24 }
 0x5e5   :  { %v806_v26 = vpop.permute.xlu1 %805 }
 0x5e6   :  { %v814_v27 = vsel %vm812_vm7, %v811_v25, %v806_v26 }
 0x5e7   :  { %v817_v28 = vsel %vm815_vm8, %v814_v27, 0.0 }
 0x5e8   :  { %819 = vst [vmem:[%s1343_s13 + $0x8] sm:$0xff] %v817_v28 }

</bundles_post_ra>
